<compile_context>
chip_gen: v5e
topology: v5e:2x2
jax: 0.10.0
libtpu: 0.0.40
codegen_flags: <defaults>
</compile_context>

<pallas_src>
import math

import jax
import jax.numpy as jnp
from jax.experimental import pallas as pl
from jax.experimental.pallas import tpu as pltpu


def _round_up(x: int, m: int) -> int:
    return (x + m - 1) // m * m


def mlp_kernel(x_ref, w1_ref, b1_ref, w2_ref, b2_ref, o_ref):
    # Layer 1: bf16 x bf16 -> f32 accumulation on the MXU, bias add in f32.
    h = jnp.dot(x_ref[...], w1_ref[...], preferred_element_type=jnp.float32)
    h = h + b1_ref[...]
    # Layer 2: cast activations back to bf16 for the MXU, accumulate in f32.
    y = jnp.dot(h.astype(jnp.bfloat16), w2_ref[...],
                preferred_element_type=jnp.float32)
    y = y + b2_ref[...]
    o_ref[...] = y.astype(o_ref.dtype)


def fully_connected_model_pallas(x_nchw, w1, b1, w2, b2):
    """Forward pass of nn.Flatten -> nn.Linear(D, H) -> nn.Linear(H, O).

    x_nchw: [B, C, H, W] float32
    w1: [D, H] (transpose of PyTorch's [H, D]),  b1: [H]
    w2: [H, O] (transpose of PyTorch's [O, H]),  b2: [O]
    Returns [B, O] float32.
    """
    B = x_nchw.shape[0]
    D = math.prod(x_nchw.shape[1:])
    H = w1.shape[1]
    O = w2.shape[1]

    # ---- lane / sublane padding & batch tiling ---------------------------
    LANE, SUB = 128, 8
    D_p = _round_up(D, LANE)
    H_p = _round_up(H, LANE)
    O_p = _round_up(O, LANE)
    if B <= 128:
        TB = _round_up(B, SUB)          # one sublane-aligned batch tile
        B_p = TB
    else:
        TB = 128                        # stream 128-row tiles, pipelined
        B_p = _round_up(B, TB)

    x = x_nchw.reshape(B, D)            # nn.Flatten() (row-major, matches torch)

    # Zero-pad (zeros are exact in bf16, so padded columns/rows contribute 0).
    x_p = jnp.zeros((B_p, D_p), jnp.bfloat16).at[:B, :D].set(x.astype(jnp.bfloat16))
    w1_p = jnp.zeros((D_p, H_p), jnp.bfloat16).at[:D, :H].set(w1.astype(jnp.bfloat16))
    b1_p = jnp.zeros((1, H_p), jnp.float32).at[0, :H].set(b1.reshape(-1))
    w2_p = jnp.zeros((H_p, O_p), jnp.bfloat16).at[:H, :O].set(w2.astype(jnp.bfloat16))
    b2_p = jnp.zeros((1, O_p), jnp.float32).at[0, :O].set(b2.reshape(-1))

    grid = (B_p // TB,)

    cost = pl.CostEstimate(
        flops=2 * B_p * D_p * H_p + 2 * B_p * H_p * O_p,
        transcendentals=0,
        bytes_accessed=(x_p.size * 2 + w1_p.size * 2 + w2_p.size * 2
                        + b1_p.size * 4 + b2_p.size * 4 + B_p * O_p * 4),
    )

    out_p = pl.pallas_call(
        mlp_kernel,
        out_shape=jax.ShapeDtypeStruct((B_p, O_p), jnp.float32),
        grid_spec=pltpu.PrefetchScalarGridSpec(
            num_scalar_prefetch=0,
            grid=grid,
            in_specs=[
                # Activations: streamed per batch tile (double-buffered by Pallas).
                pl.BlockSpec((TB, D_p), lambda i: (i, 0)),
                # Weights / biases: constant index_map -> resident across the grid.
                pl.BlockSpec((D_p, H_p), lambda i: (0, 0)),
                pl.BlockSpec((1, H_p), lambda i: (0, 0)),
                pl.BlockSpec((H_p, O_p), lambda i: (0, 0)),
                pl.BlockSpec((1, O_p), lambda i: (0, 0)),
            ],
            out_specs=pl.BlockSpec((TB, O_p), lambda i: (i, 0)),
        ),
        compiler_params=pltpu.CompilerParams(
            # Batch tiles are independent: shard across v7x's 2 TensorCores,
            # neutral on single-TC v5e/v6e.
            dimension_semantics=("parallel",),
            vmem_limit_bytes=32 * 1024 * 1024,
        ),
        cost_estimate=cost,
    )(x_p, w1_p, b1_p, w2_p, b2_p)

    return out_p[:B, :O]


def init_linear_params(key, fan_in, fan_out):
    """Deterministic init mimicking torch.nn.Linear default U(-1/sqrt(fan_in), +1/sqrt(fan_in))."""
    k_w, k_b = jax.random.split(key)
    bound = 1.0 / math.sqrt(fan_in)
    # stored as [in, out] (transpose of PyTorch's [out, in])
    w = jax.random.uniform(k_w, (fan_in, fan_out), jnp.float32, -bound, bound)
    b = jax.random.uniform(k_b, (fan_out,), jnp.float32, -bound, bound)
    return w, b


if __name__ == "__main__":
    # Small shapes consistent with the module: x = [B=2, C=4, H=16, W=16]
    # => input_shape = 4*16*16 = 1024, hidden_units = 32, output_shape = 10
    B, C, Hs, Ws = 2, 4, 16, 16
    input_shape = C * Hs * Ws
    hidden_units = 32
    output_shape = 10

    key = jax.random.PRNGKey(0)
    k_x, k_l1, k_l2 = jax.random.split(key, 3)

    x = jax.random.normal(k_x, (B, C, Hs, Ws), jnp.float32)
    w1, b1 = init_linear_params(k_l1, input_shape, hidden_units)
    w2, b2 = init_linear_params(k_l2, hidden_units, output_shape)

    out = fully_connected_model_pallas(x, w1, b1, w2, b2)
    out = jax.block_until_ready(out)
    assert out.shape == (B, output_shape)

    # Pure-JAX reference of the same forward pass with bf16-rounded operands
    # (matches the kernel's MXU numerics: bf16 inputs, f32 accumulation).
    xb = x.reshape(B, -1).astype(jnp.bfloat16).astype(jnp.float32)
    w1b = w1.astype(jnp.bfloat16).astype(jnp.float32)
    w2b = w2.astype(jnp.bfloat16).astype(jnp.float32)
    h_ref = xb @ w1b + b1.reshape(1, -1)
    h_ref = h_ref.astype(jnp.bfloat16).astype(jnp.float32)
    ref = h_ref @ w2b + b2.reshape(1, -1)
    assert jnp.allclose(out, ref, atol=1e-2, rtol=1e-2)

    # Sanity against the full-precision f32 forward (loose tolerance for bf16).
    ref_f32 = x.reshape(B, -1) @ w1 + b1.reshape(1, -1)
    ref_f32 = ref_f32 @ w2 + b2.reshape(1, -1)
    assert jnp.allclose(out, ref_f32, atol=5e-2, rtol=5e-2)

    print("KERNEL_OK")
</pallas_src>

<mosaic_0001>
module attributes {stable_mosaic.version = 11 : i64} {
  func.func @mlp_kernel(%arg0: i32, %arg1: memref<8x1024xbf16, #tpu.memory_space<vmem>>, %arg2: memref<1024x128xbf16, #tpu.memory_space<vmem>>, %arg3: memref<1x128xf32, #tpu.memory_space<vmem>>, %arg4: memref<128x128xbf16, #tpu.memory_space<vmem>>, %arg5: memref<1x128xf32, #tpu.memory_space<vmem>>, %arg6: memref<8x128xf32, #tpu.memory_space<vmem>>) attributes {dimension_semantics = [#tpu.dimension_semantics<parallel>], iteration_bounds = array<i64: 1>, scalar_prefetch = 0 : i64, scratch_operands = 0 : i64, tpu.core_type = #tpu.core_type<tc>, window_params = [{transform_indices = @transform_0, window_bounds = array<i64: 8, 1024>}, {pipeline_mode = #tpu.pipeline_mode<synchronous>, transform_indices = @transform_1, window_bounds = array<i64: 1024, 128>}, {pipeline_mode = #tpu.pipeline_mode<synchronous>, transform_indices = @transform_2, window_bounds = array<i64: 1, 128>}, {pipeline_mode = #tpu.pipeline_mode<synchronous>, transform_indices = @transform_3, window_bounds = array<i64: 128, 128>}, {pipeline_mode = #tpu.pipeline_mode<synchronous>, transform_indices = @transform_4, window_bounds = array<i64: 1, 128>}, {transform_indices = @transform_5, window_bounds = array<i64: 8, 128>}]} {
    %c0 = arith.constant 0 : index
    %c0_0 = arith.constant 0 : index
    %0 = vector.load %arg1[%c0, %c0_0] : memref<8x1024xbf16, #tpu.memory_space<vmem>>, vector<8x1024xbf16>
    %c0_1 = arith.constant 0 : index
    %c0_2 = arith.constant 0 : index
    %1 = vector.load %arg2[%c0_1, %c0_2] : memref<1024x128xbf16, #tpu.memory_space<vmem>>, vector<1024x128xbf16>
    %cst = arith.constant dense<0.000000e+00> : vector<8x128xf32>
    %2 = tpu.matmul %0, %1, %cst {dimension_numbers = #tpu.dot_dimension_numbers<[1], [0], [0], [1], [0, 0, 1, 1], [], []>} : vector<8x1024xbf16>, vector<1024x128xbf16>, vector<8x128xf32> -> vector<8x128xf32>
    %c0_3 = arith.constant 0 : index
    %c0_4 = arith.constant 0 : index
    %3 = vector.load %arg3[%c0_3, %c0_4] : memref<1x128xf32, #tpu.memory_space<vmem>>, vector<1x128xf32>
    %4 = vector.broadcast %3 : vector<1x128xf32> to vector<8x128xf32>
    %5 = arith.addf %2, %4 : vector<8x128xf32>
    %6 = arith.truncf %5 : vector<8x128xf32> to vector<8x128xbf16>
    %c0_5 = arith.constant 0 : index
    %c0_6 = arith.constant 0 : index
    %7 = vector.load %arg4[%c0_5, %c0_6] : memref<128x128xbf16, #tpu.memory_space<vmem>>, vector<128x128xbf16>
    %cst_7 = arith.constant dense<0.000000e+00> : vector<8x128xf32>
    %8 = tpu.matmul %6, %7, %cst_7 {dimension_numbers = #tpu.dot_dimension_numbers<[1], [0], [0], [1], [0, 0, 1, 1], [], []>} : vector<8x128xbf16>, vector<128x128xbf16>, vector<8x128xf32> -> vector<8x128xf32>
    %c0_8 = arith.constant 0 : index
    %c0_9 = arith.constant 0 : index
    %9 = vector.load %arg5[%c0_8, %c0_9] : memref<1x128xf32, #tpu.memory_space<vmem>>, vector<1x128xf32>
    %10 = vector.broadcast %9 : vector<1x128xf32> to vector<8x128xf32>
    %11 = arith.addf %8, %10 : vector<8x128xf32>
    %c0_10 = arith.constant 0 : index
    %c0_11 = arith.constant 0 : index
    %12 = vector.load %arg6[%c0_10, %c0_11] : memref<8x128xf32, #tpu.memory_space<vmem>>, vector<8x128xf32>
    tpu.vector_store %arg6[%c0_10, %c0_11], %11 {strides = array<i32>} : memref<8x128xf32, #tpu.memory_space<vmem>>, vector<8x128xf32>,
    return
  }
  func.func @transform_0(%arg0: i32) -> (i32, i32) {
    %c0_i32 = arith.constant 0 : i32
    %c0_i32_0 = arith.constant 0 : i32
    return %arg0, %c0_i32 : i32, i32
  }
  func.func @transform_1(%arg0: i32) -> (i32, i32) {
    %c0_i32 = arith.constant 0 : i32
    %c0_i32_0 = arith.constant 0 : i32
    %c0_i32_1 = arith.constant 0 : i32
    return %c0_i32, %c0_i32_0 : i32, i32
  }
  func.func @transform_2(%arg0: i32) -> (i32, i32) {
    %c0_i32 = arith.constant 0 : i32
    %c0_i32_0 = arith.constant 0 : i32
    %c0_i32_1 = arith.constant 0 : i32
    return %c0_i32, %c0_i32_0 : i32, i32
  }
  func.func @transform_3(%arg0: i32) -> (i32, i32) {
    %c0_i32 = arith.constant 0 : i32
    %c0_i32_0 = arith.constant 0 : i32
    %c0_i32_1 = arith.constant 0 : i32
    return %c0_i32, %c0_i32_0 : i32, i32
  }
  func.func @transform_4(%arg0: i32) -> (i32, i32) {
    %c0_i32 = arith.constant 0 : i32
    %c0_i32_0 = arith.constant 0 : i32
    %c0_i32_1 = arith.constant 0 : i32
    return %c0_i32, %c0_i32_0 : i32, i32
  }
  func.func @transform_5(%arg0: i32) -> (i32, i32) {
    %c0_i32 = arith.constant 0 : i32
    %c0_i32_0 = arith.constant 0 : i32
    return %arg0, %c0_i32 : i32, i32
  }
}

</mosaic_0001>

<bundles_post_ra>
// kernel: tpu_custom_call.1
= control target key start
LH: loop header
LB: loop body
LE: loop exit
PB: predicated region body
PF: predicated region fallthrough
CT: control target
= control target key end

     0   :  { %10 = vsyncpa [#allocation3], 0  ;;  %s1343_s0 = inlined_call_operand.hbm [shape: bf16[8,1024], index: 0, kind: input, shape index: {}]   ;;  %s1344_s1 = inlined_call_operand.hbm [shape: bf16[1024,128], index: 1, kind: input, shape index: {}]   ;;  %s1345_s2 = inlined_call_operand.vmem [shape: f32[1,128], index: 2, kind: input, shape index: {}]   ;;  %s1346_s3 = inlined_call_operand.hbm [shape: bf16[128,128], index: 3, kind: input, shape index: {}]   ;;  %s1347_s4 = inlined_call_operand.vmem [shape: f32[1,128], index: 4, kind: input, shape index: {}]   ;;  %s1348_s5 = inlined_call_operand.hbm [shape: f32[8,128], index: 5, kind: output, shape index: {}]  }
   0x1   :  { %11 = vsyncpa [#allocation6], 0  ;;  %s28_s20 = sshll.u32 %s1344_s1, 4  ;;  %s29_s20 = int_to_ptr.hbm [resolvable:$true] %s28_s20 }
   0x2   :  { %12 = vsyncpa [#allocation4], 0  ;;  %s1289_s21 = smov [#allocation5]   ;;  %s18_s25 = sshll.u32 %s1343_s0, 4  ;;  %s19_s25 = int_to_ptr.hbm [resolvable:$true] %s18_s25 }
   0x3   :  { %s30_s22 = sshll.u32 %s1289_s21, 4  ;;  %s1290_s26 = smov 64   ;;  %s31_s22 = int_to_ptr.vmem [resolvable:$true] %s30_s22 }
   0x4   :  { %s1291_s27 = smov 4   ;;  %s1292_s28 = smov [#allocation2]  }
   0x5   :  { %36 = dma.hbm_to_vmem [thread:$0]  %s29_s20, 8192, %s31_s22, [#allocation6], %s1290_s26, %s1290_s26, %s1291_s27  }
   0x6   :  { %s20_s29 = sshll.u32 %s1292_s28, 4  ;;  %s43_s7 = sshll.u32 %s1346_s3, 4  ;;  %s21_s29 = int_to_ptr.vmem [resolvable:$true] %s20_s29  ;;  %s44_s7 = int_to_ptr.hbm [resolvable:$true] %s43_s7 }
   0x7   :  { %23 = dma.hbm_to_vmem [thread:$0]  %s19_s25, 512, %s21_s29, [#allocation3]  }
   0x8   :  { %s1293_s1 = smov [#allocation7]  }
   0x9   :  { %s45_s8 = sshll.u32 %s1293_s1, 4  ;;  %s46_s8 = int_to_ptr.vmem [resolvable:$true] %s45_s8 }
   0xa   :  { %51 = dma.hbm_to_vmem [thread:$0]  %s44_s7, 1024, %s46_s8, [#allocation6], %s1290_s26, %s1290_s26, %s1291_s27  }
   0xb   :  { %1283 = dma.done.wait [#allocation3], 512  }
   0xc   :  { %1284 = vsyncadd [#allocation3], 4294966784 }
   0xd   :  { %1285 = dma.done.wait [#allocation6], 9216  }
   0xe   :  { %1286 = vsyncadd [#allocation6], 4294958080  ;;  %v1114_v0 = vld [vmem:[#allocation5 + $0x38] sm:$0xff]  ;;  %v1113_v4 = vld [vmem:[#allocation5 + $0x30] sm:$0xff]  ;;  %s1294_s10 = smov [#allocation8]   ;;  %s808_s14 = sshll.u32 %s1348_s5, 4  ;;  %s809_s14 = int_to_ptr.hbm [resolvable:$true] %s808_s14 }
   0xf   :  { %v1122_v1 = vld [vmem:[#allocation5 + $0x78] sm:$0xff]  ;;  %614 = vmatpush.bf16.msra.mxu0 %v1114_v0  ;;  %v1121_v5 = vld [vmem:[#allocation5 + $0x70] sm:$0xff]  ;;  %v1112_v8 = vld [vmem:[#allocation5 + $0x28] sm:$0xff]  ;;  %s806_s11 = sshll.u32 %s1294_s10, 4  ;;  %s807_s11 = int_to_ptr.vmem [resolvable:$true] %s806_s11 }
  0x10   :  { %v1130_v2 = vld [vmem:[#allocation5 + $0xb8] sm:$0xff]  ;;  %627 = vmatpush.bf16.msra.mxu1 %v1122_v1  ;;  %v1129_v6 = vld [vmem:[#allocation5 + $0xb0] sm:$0xff]  ;;  %v1120_v9 = vld [vmem:[#allocation5 + $0x68] sm:$0xff] }
  0x11   :  { %v1138_v3 = vld [vmem:[#allocation5 + $0xf8] sm:$0xff]  ;;  %640 = vmatpush.bf16.msra.mxu2 %v1130_v2  ;;  %v1137_v7 = vld [vmem:[#allocation5 + $0xf0] sm:$0xff]  ;;  %v1128_v10 = vld [vmem:[#allocation5 + $0xa8] sm:$0xff] }
  0x12   :  { %653 = vmatpush.bf16.msra.mxu3 %v1138_v3  ;;  %v1136_v11 = vld [vmem:[#allocation5 + $0xe8] sm:$0xff]  ;;  %v1111_v12 = vld [vmem:[#allocation5 + $0x20] sm:$0xff]  ;;  %v1110_v16 = vld [vmem:[#allocation5 + $0x18] sm:$0xff] }
  0x13   :  { %615 = vmatpush.bf16.msra.mxu0 %v1113_v4  ;;  %v1119_v13 = vld [vmem:[#allocation5 + $0x60] sm:$0xff]  ;;  %v1118_v17 = vld [vmem:[#allocation5 + $0x58] sm:$0xff]  ;;  %v1109_v20 = vld [vmem:[#allocation5 + $0x10] sm:$0xff] }
  0x14   :  { %628 = vmatpush.bf16.msra.mxu1 %v1121_v5  ;;  %v1127_v14 = vld [vmem:[#allocation5 + $0xa0] sm:$0xff]  ;;  %v1126_v18 = vld [vmem:[#allocation5 + $0x98] sm:$0xff]  ;;  %v1117_v21 = vld [vmem:[#allocation5 + $0x50] sm:$0xff] }
  0x15   :  { %641 = vmatpush.bf16.msra.mxu2 %v1129_v6  ;;  %v1135_v15 = vld [vmem:[#allocation5 + $0xe0] sm:$0xff]  ;;  %v1134_v19 = vld [vmem:[#allocation5 + $0xd8] sm:$0xff]  ;;  %v1125_v22 = vld [vmem:[#allocation5 + $0x90] sm:$0xff] }
  0x16   :  { %654 = vmatpush.bf16.msra.mxu3 %v1137_v7  ;;  %v1133_v23 = vld [vmem:[#allocation5 + $0xd0] sm:$0xff]  ;;  %v1108_v24 = vld [vmem:[#allocation5 + $0x8] sm:$0xff]  ;;  %v66_v29 = vld [vmem:[#allocation2] sm:$0xff] }
  0x17   :  { %616 = vmatpush.bf16.msra.mxu0 %v1112_v8  ;;  %v1116_v25 = vld [vmem:[#allocation5 + $0x48] sm:$0xff]  ;;  %v1107_v30 = vld [vmem:[#allocation5] sm:$0xff]  ;;  %v206_v33 = vunpack.c.l.b16 %v66_v29  ;;  %v207_v37 = vunpack.c.h.b16 %v66_v29  ;;  %v1146_v38 = vld [vmem:[#allocation5 + $0x138] sm:$0xff] }
  0x18   :  { %629 = vmatpush.bf16.msra.mxu1 %v1120_v9  ;;  %v1124_v26 = vld [vmem:[#allocation5 + $0x88] sm:$0xff]  ;;  %v1115_v31 = vld [vmem:[#allocation5 + $0x40] sm:$0xff]  ;;  %v1154_v39 = vld [vmem:[#allocation5 + $0x178] sm:$0xff] }
  0x19   :  { %642 = vmatpush.bf16.msra.mxu2 %v1128_v10  ;;  %v1132_v27 = vld [vmem:[#allocation5 + $0xc8] sm:$0xff]  ;;  %v1123_v34 = vld [vmem:[#allocation5 + $0x80] sm:$0xff]  ;;  %v1162_v40 = vld [vmem:[#allocation5 + $0x1b8] sm:$0xff]  ;;  %v214_v43 = vpack.c.b16 %v206_v33, %v206_v33  ;;  %v215_v45 = vpack.c.b16 %v207_v37, %v207_v37 }
  0x1a   :  { %655 = vmatpush.bf16.msra.mxu3 %v1136_v11  ;;  %v67_v28 = vld [vmem:[#allocation2 + $0x8] sm:$0xff]  ;;  %v1131_v35 = vld [vmem:[#allocation5 + $0xc0] sm:$0xff]  ;;  %v1170_v41 = vld [vmem:[#allocation5 + $0x1f8] sm:$0xff] }
  0x1b   :  { %617 = vmatpush.bf16.msra.mxu0 %v1111_v12  ;;  %v208_v32 = vunpack.c.l.b16 %v67_v28  ;;  %v209_v36 = vunpack.c.h.b16 %v67_v28  ;;  %v1145_v46 = vld [vmem:[#allocation5 + $0x130] sm:$0xff]  ;;  %v1144_v50 = vld [vmem:[#allocation5 + $0x128] sm:$0xff]  ;;  %v1143_v54 = vld [vmem:[#allocation5 + $0x120] sm:$0xff] }
  0x1c   :  { %630 = vmatpush.bf16.msra.mxu1 %v1119_v13  ;;  %v1153_v47 = vld [vmem:[#allocation5 + $0x170] sm:$0xff]  ;;  %v1152_v51 = vld [vmem:[#allocation5 + $0x168] sm:$0xff]  ;;  %v1151_v55 = vld [vmem:[#allocation5 + $0x160] sm:$0xff] }
  0x1d   :  { %643 = vmatpush.bf16.msra.mxu2 %v1127_v14  ;;  %v216_v42 = vpack.c.b16 %v208_v32, %v208_v32  ;;  %v217_v44 = vpack.c.b16 %v209_v36, %v209_v36  ;;  %v1161_v48 = vld [vmem:[#allocation5 + $0x1b0] sm:$0xff]  ;;  %v1160_v52 = vld [vmem:[#allocation5 + $0x1a8] sm:$0xff]  ;;  %v1159_v56 = vld [vmem:[#allocation5 + $0x1a0] sm:$0xff] }
  0x1e   :  { %656 = vmatpush.bf16.msra.mxu3 %v1135_v15  ;;  %v1169_v49 = vld [vmem:[#allocation5 + $0x1f0] sm:$0xff]  ;;  %v1168_v53 = vld [vmem:[#allocation5 + $0x1e8] sm:$0xff]  ;;  %v1167_v57 = vld [vmem:[#allocation5 + $0x1e0] sm:$0xff] }
  0x1f   :  { %618 = vmatpush.bf16.msra.mxu0 %v1110_v16  ;;  %v1142_v58 = vld [vmem:[#allocation5 + $0x118] sm:$0xff]  ;;  %v1141_v62 = vld [vmem:[#allocation5 + $0x110] sm:$0xff]  ;;  %v1140_v2 = vld [vmem:[#allocation5 + $0x108] sm:$0xff] }
  0x20   :  { %631 = vmatpush.bf16.msra.mxu1 %v1118_v17  ;;  %v1150_v59 = vld [vmem:[#allocation5 + $0x158] sm:$0xff]  ;;  %v1149_v63 = vld [vmem:[#allocation5 + $0x150] sm:$0xff]  ;;  %v1148_v3 = vld [vmem:[#allocation5 + $0x148] sm:$0xff] }
  0x21   :  { %644 = vmatpush.bf16.msra.mxu2 %v1126_v18  ;;  %v1158_v60 = vld [vmem:[#allocation5 + $0x198] sm:$0xff]  ;;  %v1157_v0 = vld [vmem:[#allocation5 + $0x190] sm:$0xff]  ;;  %v1156_v5 = vld [vmem:[#allocation5 + $0x188] sm:$0xff] }
  0x22   :  { %657 = vmatpush.bf16.msra.mxu3 %v1134_v19  ;;  %v1166_v61 = vld [vmem:[#allocation5 + $0x1d8] sm:$0xff]  ;;  %v1165_v1 = vld [vmem:[#allocation5 + $0x1d0] sm:$0xff]  ;;  %v1164_v6 = vld [vmem:[#allocation5 + $0x1c8] sm:$0xff] }
  0x23   :  { %619 = vmatpush.bf16.msra.mxu0 %v1109_v20  ;;  %v68_v4 = vld [vmem:[#allocation2 + $0x10] sm:$0xff]  ;;  %v69_v7 = vld [vmem:[#allocation2 + $0x18] sm:$0xff]  ;;  %v1139_v10 = vld [vmem:[#allocation5 + $0x100] sm:$0xff] }
  0x24   :  { %632 = vmatpush.bf16.msra.mxu1 %v1117_v21  ;;  %v210_v8 = vunpack.c.l.b16 %v68_v4  ;;  %v211_v9 = vunpack.c.h.b16 %v68_v4  ;;  %v1147_v11 = vld [vmem:[#allocation5 + $0x140] sm:$0xff]  ;;  %v212_v12 = vunpack.c.l.b16 %v69_v7  ;;  %v213_v13 = vunpack.c.h.b16 %v69_v7  ;;  %v1178_v20 = vld [vmem:[#allocation7 + $0x38] sm:$0xff]  ;;  %v1177_v21 = vld [vmem:[#allocation7 + $0x30] sm:$0xff] }
  0x25   :  { %645 = vmatpush.bf16.msra.mxu2 %v1125_v22  ;;  %v1155_v14 = vld [vmem:[#allocation5 + $0x180] sm:$0xff]  ;;  %v1176_v22 = vld [vmem:[#allocation7 + $0x28] sm:$0xff] }
  0x26   :  { %658 = vmatpush.bf16.msra.mxu3 %v1133_v23  ;;  %v1163_v15 = vld [vmem:[#allocation5 + $0x1c0] sm:$0xff]  ;;  %v218_v16 = vpack.c.b16 %v210_v8, %v210_v8  ;;  %v219_v17 = vpack.c.b16 %v211_v9, %v211_v9  ;;  %v220_v18 = vpack.c.b16 %v212_v12, %v212_v12  ;;  %v221_v19 = vpack.c.b16 %v213_v13, %v213_v13  ;;  %v1172_v28 = vld [vmem:[#allocation7 + $0x8] sm:$0xff] }
  0x27   :  { %620 = vmatpush.bf16.msra.mxu0 %v1108_v24  ;;  %v1175_v23 = vld [vmem:[#allocation7 + $0x20] sm:$0xff]  ;;  %v1174_v24 = vld [vmem:[#allocation7 + $0x18] sm:$0xff] }
  0x28   :  { %633 = vmatpush.bf16.msra.mxu1 %v1116_v25  ;;  %v1173_v25 = vld [vmem:[#allocation7 + $0x10] sm:$0xff] }
  0x29   :  { %646 = vmatpush.bf16.msra.mxu2 %v1124_v26 }
  0x2a   :  { %659 = vmatpush.bf16.msra.mxu3 %v1132_v27 }
  0x2b   :  { %621 = vmatpush.bf16.msra.mxu0 %v1107_v30  ;;  %v1171_v30 = vld [vmem:[#allocation7] sm:$0xff] }
  0x2c   :  { %634 = vmatpush.bf16.msra.mxu1 %v1115_v31 }
  0x2d   :  { %647 = vmatpush.bf16.msra.mxu2 %v1123_v34  ;;  %v1185_v34 = vld [vmem:[%s1345_s2] ss:$0 sm:$0xff] }
  0x2e   :  { %660 = vmatpush.bf16.msra.mxu3 %v1131_v35  ;;  %622 = vmatmul.bf16.vlgmr.msra.gmra.mxu0 %v214_v43 }
  0x2f   :  { %666 = vmatpush.bf16.msrb.mxu0 %v1146_v38  ;;  %635 = vmatmul.bf16.vlgmr.msra.gmra.mxu1 %v215_v45 }
  0x30   :  { %679 = vmatpush.bf16.msrb.mxu1 %v1154_v39  ;;  %648 = vmatmul.bf16.vlgmr.msra.gmra.mxu2 %v216_v42 }
  0x31   :  { %692 = vmatpush.bf16.msrb.mxu2 %v1162_v40  ;;  %661 = vmatmul.bf16.vlgmr.msra.gmra.mxu3 %v217_v44 }
  0x32   :  { %705 = vmatpush.bf16.msrb.mxu3 %v1170_v41 }
  0x33   :  { %667 = vmatpush.bf16.msrb.mxu0 %v1145_v46 }
  0x34   :  { %680 = vmatpush.bf16.msrb.mxu1 %v1153_v47 }
  0x35   :  { %693 = vmatpush.bf16.msrb.mxu2 %v1161_v48 }
  0x36   :  { %706 = vmatpush.bf16.msrb.mxu3 %v1169_v49 }
  0x37   :  { %668 = vmatpush.bf16.msrb.mxu0 %v1144_v50 }
  0x38   :  { %681 = vmatpush.bf16.msrb.mxu1 %v1152_v51 }
  0x39   :  { %694 = vmatpush.bf16.msrb.mxu2 %v1160_v52 }
  0x3a   :  { %707 = vmatpush.bf16.msrb.mxu3 %v1168_v53 }
  0x3b   :  { %669 = vmatpush.bf16.msrb.mxu0 %v1143_v54  ;;  %v1186_v54 = vld [vmem:[%s1347_s4] ss:$0 sm:$0xff] }
  0x3c   :  { %682 = vmatpush.bf16.msrb.mxu1 %v1151_v55 }
  0x3d   :  { %695 = vmatpush.bf16.msrb.mxu2 %v1159_v56 }
  0x3e   :  { %708 = vmatpush.bf16.msrb.mxu3 %v1167_v57 }
  0x3f   :  { %670 = vmatpush.bf16.msrb.mxu0 %v1142_v58 }
  0x40   :  { %683 = vmatpush.bf16.msrb.mxu1 %v1150_v59 }
  0x41   :  { %696 = vmatpush.bf16.msrb.mxu2 %v1158_v60 }
  0x42   :  { %709 = vmatpush.bf16.msrb.mxu3 %v1166_v61 }
  0x43   :  { %671 = vmatpush.bf16.msrb.mxu0 %v1141_v62 }
  0x44   :  { %684 = vmatpush.bf16.msrb.mxu1 %v1149_v63 }
  0x45   :  { %697 = vmatpush.bf16.msrb.mxu2 %v1157_v0 }
  0x46   :  { %710 = vmatpush.bf16.msrb.mxu3 %v1165_v1 }
  0x47   :  { %672 = vmatpush.bf16.msrb.mxu0 %v1140_v2 }
  0x48   :  { %685 = vmatpush.bf16.msrb.mxu1 %v1148_v3 }
  0x49   :  { %698 = vmatpush.bf16.msrb.mxu2 %v1156_v5 }
  0x4a   :  { %711 = vmatpush.bf16.msrb.mxu3 %v1164_v6 }
  0x4b   :  { %673 = vmatpush.bf16.msrb.mxu0 %v1139_v10 }
  0x4c   :  { %686 = vmatpush.bf16.msrb.mxu1 %v1147_v11 }
  0x4d   :  { %699 = vmatpush.bf16.msrb.mxu2 %v1155_v14 }
  0x4e   :  { %712 = vmatpush.bf16.msrb.mxu3 %v1163_v15  ;;  %674 = vmatmul.bf16.vlgmr.msrb.gmra.mxu0 %v218_v16 }
  0x4f   :  { %687 = vmatmul.bf16.vlgmr.msrb.gmra.mxu1 %v219_v17  ;;  %787 = vmatpush.bf16.msra.mxu0 %v1178_v20 }
  0x50   :  { %700 = vmatmul.bf16.vlgmr.msrb.gmra.mxu2 %v220_v18 }
  0x51   :  { %713 = vmatmul.bf16.vlgmr.msrb.gmra.mxu3 %v221_v19 }
  0x53   :  { %788 = vmatpush.bf16.msra.mxu0 %v1177_v21 }
  0x57   :  { %789 = vmatpush.bf16.msra.mxu0 %v1176_v22 }
  0x5b   :  { %790 = vmatpush.bf16.msra.mxu0 %v1175_v23 }
  0x5f   :  { %791 = vmatpush.bf16.msra.mxu0 %v1174_v24 }
  0x63   :  { %792 = vmatpush.bf16.msra.mxu0 %v1173_v25 }
  0x67   :  { %793 = vmatpush.bf16.msra.mxu0 %v1172_v28 }
  0x6b   :  { %794 = vmatpush.bf16.msra.mxu0 %v1171_v30 }
  0xab   :  { %v623_v26 = vpop.f32.mrf.mxu0 }
  0xac   :  { %v636_v27 = vpop.f32.mrf.mxu1  ;;  %v624_v37 = vadd.f32 %v1185_v34, %v623_v26 }
  0xae   :  { %v637_v38 = vadd.f32 %v636_v27, %v624_v37 }
  0xb3   :  { %v649_v29 = vpop.f32.mrf.mxu2  ;;  %v625_v32 = vpop.f32.mrf.mxu0 }
  0xb4   :  { %v662_v31 = vpop.f32.mrf.mxu3  ;;  %v638_v33 = vpop.f32.mrf.mxu1  ;;  %v650_v39 = vadd.f32 %v649_v29, %v637_v38 }
  0xb6   :  { %v663_v40 = vadd.f32 %v662_v31, %v650_v39 }
  0xbb   :  { %v651_v35 = vpop.f32.mrf.mxu2 }
  0xbc   :  { %v664_v36 = vpop.f32.mrf.mxu3 }
  0xcb   :  { %v675_v41 = vpop.f32.mrf.mxu0 }
  0xcc   :  { %v688_v42 = vpop.f32.mrf.mxu1  ;;  %v676_v43 = vadd.f32 %v675_v41, %v663_v40 }
  0xce   :  { %v689_v44 = vadd.f32 %v688_v42, %v676_v43 }
  0xd3   :  { %v701_v45 = vpop.f32.mrf.mxu2  ;;  %v677_v48 = vpop.f32.mrf.mxu0 }
  0xd4   :  { %v714_v46 = vpop.f32.mrf.mxu3  ;;  %v702_v47 = vadd.f32 %v701_v45, %v689_v44  ;;  %v690_v49 = vpop.f32.mrf.mxu1 }
  0xd6   :  { %v715_v50 = vadd.f32 %v714_v46, %v702_v47 }
  0xd8   :  { %v718_v51 = vpack.c.bf16 %v715_v50, %v715_v50 }
  0xda   :  { %795 = vmatmul.bf16.vlgmr.msra.gmra.mxu0 %v718_v51 }
  0xdb   :  { %v703_v52 = vpop.f32.mrf.mxu2 }
  0xdc   :  { %v716_v53 = vpop.f32.mrf.mxu3 }
 0x157   :  { %v796_v55 = vpop.f32.mrf.mxu0 }
 0x158   :  { %v797_v56 = vadd.f32 %v1186_v54, %v796_v55 }
 0x15a   :  { %800 = vst [vmem:[#allocation8] sm:$0xff] %v797_v56 }
 0x15b   :  { %811 = dma.vmem_to_hbm [thread:$0]  %s807_s11, 128, %s809_s14, [#allocation4]  }
 0x15f   :  { %v798_v57 = vpop.f32.mrf.mxu0 }
 0x160   :  { %1287 = dma.done.wait [#allocation4], 128  }
 0x161   :  { %1288 = vsyncadd [#allocation4], 4294967168 }
 0x162   :  { %816 = vsyncpa [#allocation3], 1 }
 0x163   :  { %817 = vsyncpa [#allocation6], 1 }
 0x164   :  { %818 = vsyncpa [#allocation4], 1 }

</bundles_post_ra>
